<compile_context>
chip_gen: v7x
topology: tpu7x:2x2x1
jax: 0.10.0
libtpu: 0.0.40
codegen_flags: <defaults>
</compile_context>

<pallas_src>
import jax
import jax.numpy as jnp
from jax.experimental import pallas as pl
from jax.experimental.pallas import tpu as pltpu


EPS = 1e-5        # BatchNorm1d eps
NORM_EPS = 1e-12  # L2-normalize clamp (avoids NaN on an all-zero row)
LANE = 128        # TPU lane width; output / hidden feature dims are padded to this


# --------------------------------------------------------------------------------------
# Kernel (one grid point == one complete, independent BatchNorm batch)
# --------------------------------------------------------------------------------------
def _seq_inception_kernel(x_ref, w1_ref, w_ref, b_ref, out_ref):
    """x_ref: [B, K1] f32 (narrow K, un-padded input)
       w1_ref: [K1, 128] bf16 folded layer1 weight
       w_ref:  [3, 128, 128] bf16 folded layer2/layer3/classifier weights
       b_ref:  [4, 1, 128] f32 folded biases
       out_ref:[B, 128] f32 lane-dense output (real out_dim in the low lanes)."""
    inv_b = 1.0 / x_ref.shape[0]
    b_all = b_ref[...]  # load the tiny bias slab once

    def bn_standardize(h):
        # Training-mode BatchNorm1d statistics (biased variance), one reduction pass, f32.
        s1 = jnp.sum(h, axis=0, keepdims=True)
        s2 = jnp.sum(h * h, axis=0, keepdims=True)
        mu = s1 * inv_b
        var = jnp.maximum(s2 * inv_b - mu * mu, 0.0)
        return (h - mu) * jax.lax.rsqrt(var + EPS)

    def linear(n, w_bf16, idx):
        # gamma/beta/bias pre-folded into (w, b):  BN(h) @ W + c == h_hat @ W' + b'.
        # Only the dot operands go bf16 (MXU native); accumulate + bias add in f32.
        return (jnp.dot(n.astype(jnp.bfloat16), w_bf16,
                        preferred_element_type=jnp.float32)
                + b_all[idx])

    h = x_ref[...]
    h = jnp.maximum(linear(bn_standardize(h), w1_ref[...], 0), 0.0)   # layer1
    h = jnp.maximum(linear(bn_standardize(h), w_ref[0], 1), 0.0)      # layer2
    h = jnp.maximum(linear(bn_standardize(h), w_ref[1], 2), 0.0)      # layer3
    y = linear(bn_standardize(h), w_ref[2], 3)                        # classifier

    # L2 normalize along features (padded lanes are exactly zero -> no bias on the norm).
    sumsq = jnp.sum(y * y, axis=1, keepdims=True)
    out_ref[...] = y * jax.lax.rsqrt(sumsq + NORM_EPS)


# --------------------------------------------------------------------------------------
# Host-side parameter folding / packing
# --------------------------------------------------------------------------------------
def _pad2(a, rows, cols):
    return jnp.pad(a, ((0, rows - a.shape[0]), (0, cols - a.shape[1])))


def pack_params(params):
    """Fold BN gamma/beta + Linear bias into the weights, pad, pack, cast weights to bf16."""
    def fold(g, b, w, c):
        return g.reshape(-1, 1) * w, b @ w + c        # W' = gamma*W ; b' = beta@W + c

    w1, c1 = fold(params["g1"], params["b1"], params["w1"], params["c1"])
    w2, c2 = fold(params["g2"], params["b2"], params["w2"], params["c2"])
    w3, c3 = fold(params["g3"], params["b3"], params["w3"], params["c3"])
    wc, cc = fold(params["gc"], params["bc"], params["wc"], params["cc"])

    in_dim = w1.shape[0]
    k_pad = ((in_dim + 7) // 8) * 8                   # sublane-pad K only (NOT to 128)
    w1_p = _pad2(w1, k_pad, LANE).astype(jnp.bfloat16)                    # [K1, 128]
    w_slab = jnp.stack([_pad2(w, LANE, LANE) for w in (w2, w3, wc)]
                       ).astype(jnp.bfloat16)                             # [3, 128, 128]
    b_slab = jnp.stack([_pad2(c, 1, LANE) for c in (c1, c2, c3, cc)])     # [4, 1, 128] f32
    return w1_p, w_slab, b_slab


def sequence_inception_forward(x, packed, out_dim, num_batches=1):
    """x: [num_batches * B, in_dim] f32; each contiguous B-row block is one *independent*
    BatchNorm batch (num_batches=1 reproduces the module's forward exactly).
    Returns [num_batches * B, out_dim] L2-normalized embeddings."""
    w1_p, w_slab, b_slab = packed
    total_b, in_dim = x.shape
    assert total_b % num_batches == 0
    b_sub = total_b // num_batches
    # Sublane constraint: per-batch row count must be a multiple of 8 (or the full extent).
    assert num_batches == 1 or b_sub % 8 == 0

    k_pad = w1_p.shape[0]
    if k_pad != in_dim:  # sublane-pad K to a multiple of 8 only (8x cheaper than 128-pad)
        x = jnp.pad(x, ((0, 0), (0, k_pad - in_dim)))

    out = pl.pallas_call(
        _seq_inception_kernel,
        out_shape=jax.ShapeDtypeStruct((total_b, LANE), jnp.float32),
        grid=(num_batches,),
        in_specs=[
            pl.BlockSpec((b_sub, k_pad), lambda i: (i, 0)),        # x: streamed per batch
            pl.BlockSpec(w1_p.shape, lambda i: (0, 0)),            # weights: VMEM-resident
            pl.BlockSpec(w_slab.shape, lambda i: (0, 0, 0)),
            pl.BlockSpec(b_slab.shape, lambda i: (0, 0, 0)),
        ],
        out_specs=pl.BlockSpec((b_sub, LANE), lambda i: (i, 0)),   # lane-dense 128 stores
        compiler_params=pltpu.CompilerParams(
            # Independent BN batches -> safe to shard across TensorCores (v7x megacore)
            # and to double-buffer x/out DMAs against compute on all generations.
            dimension_semantics=("parallel",),
            vmem_limit_bytes=32 * 1024 * 1024,   # safe ceiling on v5e/v6e/v7x
        ),
    )(x, w1_p, w_slab, b_slab)

    return out[:, :out_dim]


# --------------------------------------------------------------------------------------
# Synthetic parameters + pure-JAX f32 reference (unfolded, two-pass BN) for validation
# --------------------------------------------------------------------------------------
def init_params(key, in_dim, middle_dim, out_dim):
    ks = jax.random.split(key, 16)
    p = {}

    def bn_params(kg, kb, dim):
        gamma = jax.random.uniform(kg, (1, dim), jnp.float32, 0.5, 1.5)
        beta = 0.1 * jax.random.normal(kb, (1, dim), jnp.float32)
        return gamma, beta

    def lin_params(kw, kc, fan_in, fan_out):
        bound = 1.0 / jnp.sqrt(float(fan_in))
        w = jax.random.uniform(kw, (fan_in, fan_out), jnp.float32, -bound, bound)
        c = jax.random.uniform(kc, (1, fan_out), jnp.float32, -bound, bound)
        return w, c

    p["g1"], p["b1"] = bn_params(ks[0], ks[1], in_dim)
    p["w1"], p["c1"] = lin_params(ks[2], ks[3], in_dim, middle_dim)
    p["g2"], p["b2"] = bn_params(ks[4], ks[5], middle_dim)
    p["w2"], p["c2"] = lin_params(ks[6], ks[7], middle_dim, middle_dim)
    p["g3"], p["b3"] = bn_params(ks[8], ks[9], middle_dim)
    p["w3"], p["c3"] = lin_params(ks[10], ks[11], middle_dim, middle_dim)
    p["gc"], p["bc"] = bn_params(ks[12], ks[13], middle_dim)
    p["wc"], p["cc"] = lin_params(ks[14], ks[15], middle_dim, out_dim)
    return p


def reference_forward(x, p):
    """Pure-JAX f32 reference mirroring the PyTorch forward (training-mode BN)."""
    def bn(h, g, b):
        mu = jnp.mean(h, axis=0, keepdims=True)
        var = jnp.mean((h - mu) ** 2, axis=0, keepdims=True)
        return (h - mu) / jnp.sqrt(var + EPS) * g + b

    h = x
    h = jnp.maximum(bn(h, p["g1"], p["b1"]) @ p["w1"] + p["c1"], 0.0)
    h = jnp.maximum(bn(h, p["g2"], p["b2"]) @ p["w2"] + p["c2"], 0.0)
    h = jnp.maximum(bn(h, p["g3"], p["b3"]) @ p["w3"] + p["c3"], 0.0)
    y = bn(h, p["gc"], p["bc"]) @ p["wc"] + p["cc"]
    return y / jnp.linalg.norm(y, axis=1, keepdims=True)


# --------------------------------------------------------------------------------------
if __name__ == "__main__":
    B, IN_DIM, MID_DIM, OUT_DIM = 8, 16, 32, 64

    key = jax.random.PRNGKey(0)
    kx, kp = jax.random.split(key)
    x = jax.random.normal(kx, (B, IN_DIM), jnp.float32)
    params = init_params(kp, IN_DIM, MID_DIM, OUT_DIM)

    # One-time host-side folding / packing of the 16 parameter tensors into 3 slabs.
    packed = tuple(jax.block_until_ready(a) for a in pack_params(params))

    # --- single BN batch: exactly the PyTorch module's forward ---
    out = jax.block_until_ready(sequence_inception_forward(x, packed, OUT_DIM))
    ref = reference_forward(x, params)
    assert out.shape == (B, OUT_DIM)
    # bf16 MXU operands -> tolerance loosened from 1e-4 to 2e-2.
    assert bool(jnp.allclose(out, ref, rtol=2e-2, atol=2e-2))

    # --- stacked independent BN batches: exercises the parallel grid path ---
    G = 4
    xg = jax.random.normal(jax.random.PRNGKey(1), (G * B, IN_DIM), jnp.float32)
    outg = jax.block_until_ready(
        sequence_inception_forward(xg, packed, OUT_DIM, num_batches=G))
    assert outg.shape == (G * B, OUT_DIM)
    for g in range(G):
        refg = reference_forward(xg[g * B:(g + 1) * B], params)
        assert bool(jnp.allclose(outg[g * B:(g + 1) * B], refg, rtol=2e-2, atol=2e-2))

    print("KERNEL_OK")
</pallas_src>

<mosaic_0001>
module attributes {stable_mosaic.version = 11 : i64} {
  func.func @_seq_inception_kernel(%arg0: i32, %arg1: memref<8x16xf32, #tpu.memory_space<vmem>>, %arg2: memref<16x128xbf16, #tpu.memory_space<vmem>>, %arg3: memref<3x128x128xbf16, #tpu.memory_space<vmem>>, %arg4: memref<4x1x128xf32, #tpu.memory_space<vmem>>, %arg5: memref<8x128xf32, #tpu.memory_space<vmem>>) attributes {dimension_semantics = [#tpu.dimension_semantics<parallel>], iteration_bounds = array<i64: 1>, scalar_prefetch = 0 : i64, scratch_operands = 0 : i64, tpu.core_type = #tpu.core_type<tc>, window_params = [{transform_indices = @transform_0, window_bounds = array<i64: 8, 16>}, {pipeline_mode = #tpu.pipeline_mode<synchronous>, transform_indices = @transform_1, window_bounds = array<i64: 16, 128>}, {pipeline_mode = #tpu.pipeline_mode<synchronous>, transform_indices = @transform_2, window_bounds = array<i64: 3, 128, 128>}, {pipeline_mode = #tpu.pipeline_mode<synchronous>, transform_indices = @transform_3, window_bounds = array<i64: 4, 1, 128>}, {transform_indices = @transform_4, window_bounds = array<i64: 8, 128>}]} {
    %c0 = arith.constant 0 : index
    %c0_0 = arith.constant 0 : index
    %c0_1 = arith.constant 0 : index
    %0 = vector.load %arg4[%c0, %c0_0, %c0_1] : memref<4x1x128xf32, #tpu.memory_space<vmem>>, vector<4x1x128xf32>
    %c0_2 = arith.constant 0 : index
    %c0_3 = arith.constant 0 : index
    %1 = vector.load %arg1[%c0_2, %c0_3] : memref<8x16xf32, #tpu.memory_space<vmem>>, vector<8x16xf32>
    %cst = arith.constant dense<0.000000e+00> : vector<16xf32>
    %2 = vector.multi_reduction <add>, %1, %cst [0] : vector<8x16xf32> to vector<16xf32>
    %3 = vector.shape_cast %2 : vector<16xf32> to vector<1x16xf32>
    %4 = arith.mulf %1, %1 : vector<8x16xf32>
    %cst_4 = arith.constant dense<0.000000e+00> : vector<16xf32>
    %5 = vector.multi_reduction <add>, %4, %cst_4 [0] : vector<8x16xf32> to vector<16xf32>
    %6 = vector.shape_cast %5 : vector<16xf32> to vector<1x16xf32>
    %cst_5 = arith.constant 1.250000e-01 : f32
    %7 = vector.broadcast %cst_5 : f32 to vector<1x16xf32>
    %8 = arith.mulf %3, %7 : vector<1x16xf32>
    %cst_6 = arith.constant 1.250000e-01 : f32
    %9 = vector.broadcast %cst_6 : f32 to vector<1x16xf32>
    %10 = arith.mulf %6, %9 : vector<1x16xf32>
    %11 = arith.mulf %8, %8 : vector<1x16xf32>
    %12 = arith.subf %10, %11 : vector<1x16xf32>
    %cst_7 = arith.constant 0.000000e+00 : f32
    %13 = vector.broadcast %cst_7 : f32 to vector<1x16xf32>
    %14 = arith.maximumf %12, %13 : vector<1x16xf32>
    %15 = vector.broadcast %8 : vector<1x16xf32> to vector<8x16xf32>
    %16 = arith.subf %1, %15 : vector<8x16xf32>
    %cst_8 = arith.constant 9.99999974E-6 : f32
    %17 = vector.broadcast %cst_8 : f32 to vector<1x16xf32>
    %18 = arith.addf %14, %17 : vector<1x16xf32>
    %19 = math.rsqrt %18 : vector<1x16xf32>
    %20 = vector.broadcast %19 : vector<1x16xf32> to vector<8x16xf32>
    %21 = arith.mulf %16, %20 : vector<8x16xf32>
    %c0_9 = arith.constant 0 : index
    %c0_10 = arith.constant 0 : index
    %22 = vector.load %arg2[%c0_9, %c0_10] : memref<16x128xbf16, #tpu.memory_space<vmem>>, vector<16x128xbf16>
    %23 = arith.truncf %21 : vector<8x16xf32> to vector<8x16xbf16>
    %cst_11 = arith.constant dense<0.000000e+00> : vector<8x128xf32>
    %24 = tpu.matmul %23, %22, %cst_11 {dimension_numbers = #tpu.dot_dimension_numbers<[1], [0], [0], [1], [0, 0, 1, 1], [], []>} : vector<8x16xbf16>, vector<16x128xbf16>, vector<8x128xf32> -> vector<8x128xf32>
    %25 = vector.extract_strided_slice %0 {offsets = [0, 0, 0], sizes = [1, 1, 128], strides = [1, 1, 1]} : vector<4x1x128xf32> to vector<1x1x128xf32>
    %26 = vector.shape_cast %25 : vector<1x1x128xf32> to vector<1x128xf32>
    %27 = vector.broadcast %26 : vector<1x128xf32> to vector<8x128xf32>
    %28 = arith.addf %24, %27 : vector<8x128xf32>
    %cst_12 = arith.constant 0.000000e+00 : f32
    %29 = vector.broadcast %cst_12 : f32 to vector<8x128xf32>
    %30 = arith.maximumf %28, %29 : vector<8x128xf32>
    %cst_13 = arith.constant dense<0.000000e+00> : vector<128xf32>
    %31 = vector.multi_reduction <add>, %30, %cst_13 [0] : vector<8x128xf32> to vector<128xf32>
    %32 = vector.shape_cast %31 : vector<128xf32> to vector<1x128xf32>
    %33 = arith.mulf %30, %30 : vector<8x128xf32>
    %cst_14 = arith.constant dense<0.000000e+00> : vector<128xf32>
    %34 = vector.multi_reduction <add>, %33, %cst_14 [0] : vector<8x128xf32> to vector<128xf32>
    %35 = vector.shape_cast %34 : vector<128xf32> to vector<1x128xf32>
    %cst_15 = arith.constant 1.250000e-01 : f32
    %36 = vector.broadcast %cst_15 : f32 to vector<1x128xf32>
    %37 = arith.mulf %32, %36 : vector<1x128xf32>
    %cst_16 = arith.constant 1.250000e-01 : f32
    %38 = vector.broadcast %cst_16 : f32 to vector<1x128xf32>
    %39 = arith.mulf %35, %38 : vector<1x128xf32>
    %40 = arith.mulf %37, %37 : vector<1x128xf32>
    %41 = arith.subf %39, %40 : vector<1x128xf32>
    %cst_17 = arith.constant 0.000000e+00 : f32
    %42 = vector.broadcast %cst_17 : f32 to vector<1x128xf32>
    %43 = arith.maximumf %41, %42 : vector<1x128xf32>
    %44 = vector.broadcast %37 : vector<1x128xf32> to vector<8x128xf32>
    %45 = arith.subf %30, %44 : vector<8x128xf32>
    %cst_18 = arith.constant 9.99999974E-6 : f32
    %46 = vector.broadcast %cst_18 : f32 to vector<1x128xf32>
    %47 = arith.addf %43, %46 : vector<1x128xf32>
    %48 = math.rsqrt %47 : vector<1x128xf32>
    %49 = vector.broadcast %48 : vector<1x128xf32> to vector<8x128xf32>
    %50 = arith.mulf %45, %49 : vector<8x128xf32>
    %c0_19 = arith.constant 0 : index
    %c0_20 = arith.constant 0 : index
    %c0_21 = arith.constant 0 : index
    %51 = vector.load %arg3[%c0_19, %c0_20, %c0_21] : memref<3x128x128xbf16, #tpu.memory_space<vmem>>, vector<1x128x128xbf16>
    %52 = vector.shape_cast %51 : vector<1x128x128xbf16> to vector<128x128xbf16>
    %53 = arith.truncf %50 : vector<8x128xf32> to vector<8x128xbf16>
    %cst_22 = arith.constant dense<0.000000e+00> : vector<8x128xf32>
    %54 = tpu.matmul %53, %52, %cst_22 {dimension_numbers = #tpu.dot_dimension_numbers<[1], [0], [0], [1], [0, 0, 1, 1], [], []>} : vector<8x128xbf16>, vector<128x128xbf16>, vector<8x128xf32> -> vector<8x128xf32>
    %55 = vector.extract_strided_slice %0 {offsets = [1, 0, 0], sizes = [1, 1, 128], strides = [1, 1, 1]} : vector<4x1x128xf32> to vector<1x1x128xf32>
    %56 = vector.shape_cast %55 : vector<1x1x128xf32> to vector<1x128xf32>
    %57 = vector.broadcast %56 : vector<1x128xf32> to vector<8x128xf32>
    %58 = arith.addf %54, %57 : vector<8x128xf32>
    %cst_23 = arith.constant 0.000000e+00 : f32
    %59 = vector.broadcast %cst_23 : f32 to vector<8x128xf32>
    %60 = arith.maximumf %58, %59 : vector<8x128xf32>
    %cst_24 = arith.constant dense<0.000000e+00> : vector<128xf32>
    %61 = vector.multi_reduction <add>, %60, %cst_24 [0] : vector<8x128xf32> to vector<128xf32>
    %62 = vector.shape_cast %61 : vector<128xf32> to vector<1x128xf32>
    %63 = arith.mulf %60, %60 : vector<8x128xf32>
    %cst_25 = arith.constant dense<0.000000e+00> : vector<128xf32>
    %64 = vector.multi_reduction <add>, %63, %cst_25 [0] : vector<8x128xf32> to vector<128xf32>
    %65 = vector.shape_cast %64 : vector<128xf32> to vector<1x128xf32>
    %cst_26 = arith.constant 1.250000e-01 : f32
    %66 = vector.broadcast %cst_26 : f32 to vector<1x128xf32>
    %67 = arith.mulf %62, %66 : vector<1x128xf32>
    %cst_27 = arith.constant 1.250000e-01 : f32
    %68 = vector.broadcast %cst_27 : f32 to vector<1x128xf32>
    %69 = arith.mulf %65, %68 : vector<1x128xf32>
    %70 = arith.mulf %67, %67 : vector<1x128xf32>
    %71 = arith.subf %69, %70 : vector<1x128xf32>
    %cst_28 = arith.constant 0.000000e+00 : f32
    %72 = vector.broadcast %cst_28 : f32 to vector<1x128xf32>
    %73 = arith.maximumf %71, %72 : vector<1x128xf32>
    %74 = vector.broadcast %67 : vector<1x128xf32> to vector<8x128xf32>
    %75 = arith.subf %60, %74 : vector<8x128xf32>
    %cst_29 = arith.constant 9.99999974E-6 : f32
    %76 = vector.broadcast %cst_29 : f32 to vector<1x128xf32>
    %77 = arith.addf %73, %76 : vector<1x128xf32>
    %78 = math.rsqrt %77 : vector<1x128xf32>
    %79 = vector.broadcast %78 : vector<1x128xf32> to vector<8x128xf32>
    %80 = arith.mulf %75, %79 : vector<8x128xf32>
    %c1 = arith.constant 1 : index
    %c0_30 = arith.constant 0 : index
    %c0_31 = arith.constant 0 : index
    %81 = vector.load %arg3[%c1, %c0_30, %c0_31] : memref<3x128x128xbf16, #tpu.memory_space<vmem>>, vector<1x128x128xbf16>
    %82 = vector.shape_cast %81 : vector<1x128x128xbf16> to vector<128x128xbf16>
    %83 = arith.truncf %80 : vector<8x128xf32> to vector<8x128xbf16>
    %cst_32 = arith.constant dense<0.000000e+00> : vector<8x128xf32>
    %84 = tpu.matmul %83, %82, %cst_32 {dimension_numbers = #tpu.dot_dimension_numbers<[1], [0], [0], [1], [0, 0, 1, 1], [], []>} : vector<8x128xbf16>, vector<128x128xbf16>, vector<8x128xf32> -> vector<8x128xf32>
    %85 = vector.extract_strided_slice %0 {offsets = [2, 0, 0], sizes = [1, 1, 128], strides = [1, 1, 1]} : vector<4x1x128xf32> to vector<1x1x128xf32>
    %86 = vector.shape_cast %85 : vector<1x1x128xf32> to vector<1x128xf32>
    %87 = vector.broadcast %86 : vector<1x128xf32> to vector<8x128xf32>
    %88 = arith.addf %84, %87 : vector<8x128xf32>
    %cst_33 = arith.constant 0.000000e+00 : f32
    %89 = vector.broadcast %cst_33 : f32 to vector<8x128xf32>
    %90 = arith.maximumf %88, %89 : vector<8x128xf32>
    %cst_34 = arith.constant dense<0.000000e+00> : vector<128xf32>
    %91 = vector.multi_reduction <add>, %90, %cst_34 [0] : vector<8x128xf32> to vector<128xf32>
    %92 = vector.shape_cast %91 : vector<128xf32> to vector<1x128xf32>
    %93 = arith.mulf %90, %90 : vector<8x128xf32>
    %cst_35 = arith.constant dense<0.000000e+00> : vector<128xf32>
    %94 = vector.multi_reduction <add>, %93, %cst_35 [0] : vector<8x128xf32> to vector<128xf32>
    %95 = vector.shape_cast %94 : vector<128xf32> to vector<1x128xf32>
    %cst_36 = arith.constant 1.250000e-01 : f32
    %96 = vector.broadcast %cst_36 : f32 to vector<1x128xf32>
    %97 = arith.mulf %92, %96 : vector<1x128xf32>
    %cst_37 = arith.constant 1.250000e-01 : f32
    %98 = vector.broadcast %cst_37 : f32 to vector<1x128xf32>
    %99 = arith.mulf %95, %98 : vector<1x128xf32>
    %100 = arith.mulf %97, %97 : vector<1x128xf32>
    %101 = arith.subf %99, %100 : vector<1x128xf32>
    %cst_38 = arith.constant 0.000000e+00 : f32
    %102 = vector.broadcast %cst_38 : f32 to vector<1x128xf32>
    %103 = arith.maximumf %101, %102 : vector<1x128xf32>
    %104 = vector.broadcast %97 : vector<1x128xf32> to vector<8x128xf32>
    %105 = arith.subf %90, %104 : vector<8x128xf32>
    %cst_39 = arith.constant 9.99999974E-6 : f32
    %106 = vector.broadcast %cst_39 : f32 to vector<1x128xf32>
    %107 = arith.addf %103, %106 : vector<1x128xf32>
    %108 = math.rsqrt %107 : vector<1x128xf32>
    %109 = vector.broadcast %108 : vector<1x128xf32> to vector<8x128xf32>
    %110 = arith.mulf %105, %109 : vector<8x128xf32>
    %c2 = arith.constant 2 : index
    %c0_40 = arith.constant 0 : index
    %c0_41 = arith.constant 0 : index
    %111 = vector.load %arg3[%c2, %c0_40, %c0_41] : memref<3x128x128xbf16, #tpu.memory_space<vmem>>, vector<1x128x128xbf16>
    %112 = vector.shape_cast %111 : vector<1x128x128xbf16> to vector<128x128xbf16>
    %113 = arith.truncf %110 : vector<8x128xf32> to vector<8x128xbf16>
    %cst_42 = arith.constant dense<0.000000e+00> : vector<8x128xf32>
    %114 = tpu.matmul %113, %112, %cst_42 {dimension_numbers = #tpu.dot_dimension_numbers<[1], [0], [0], [1], [0, 0, 1, 1], [], []>} : vector<8x128xbf16>, vector<128x128xbf16>, vector<8x128xf32> -> vector<8x128xf32>
    %115 = vector.extract_strided_slice %0 {offsets = [3, 0, 0], sizes = [1, 1, 128], strides = [1, 1, 1]} : vector<4x1x128xf32> to vector<1x1x128xf32>
    %116 = vector.shape_cast %115 : vector<1x1x128xf32> to vector<1x128xf32>
    %117 = vector.broadcast %116 : vector<1x128xf32> to vector<8x128xf32>
    %118 = arith.addf %114, %117 : vector<8x128xf32>
    %119 = arith.mulf %118, %118 : vector<8x128xf32>
    %cst_43 = arith.constant dense<0.000000e+00> : vector<8xf32>
    %120 = vector.multi_reduction <add>, %119, %cst_43 [1] : vector<8x128xf32> to vector<8xf32>
    %121 = vector.shape_cast %120 : vector<8xf32> to vector<8x1xf32>
    %cst_44 = arith.constant 9.99999996E-13 : f32
    %122 = vector.broadcast %cst_44 : f32 to vector<8x1xf32>
    %123 = arith.addf %121, %122 : vector<8x1xf32>
    %124 = math.rsqrt %123 : vector<8x1xf32>
    %125 = vector.broadcast %124 : vector<8x1xf32> to vector<8x128xf32>
    %126 = arith.mulf %118, %125 : vector<8x128xf32>
    %c0_45 = arith.constant 0 : index
    %c0_46 = arith.constant 0 : index
    %127 = vector.load %arg5[%c0_45, %c0_46] : memref<8x128xf32, #tpu.memory_space<vmem>>, vector<8x128xf32>
    tpu.vector_store %arg5[%c0_45, %c0_46], %126 {strides = array<i32>} : memref<8x128xf32, #tpu.memory_space<vmem>>, vector<8x128xf32>,
    return
  }
  func.func @transform_0(%arg0: i32) -> (i32, i32) {
    %c0_i32 = arith.constant 0 : i32
    %c0_i32_0 = arith.constant 0 : i32
    return %arg0, %c0_i32 : i32, i32
  }
  func.func @transform_1(%arg0: i32) -> (i32, i32) {
    %c0_i32 = arith.constant 0 : i32
    %c0_i32_0 = arith.constant 0 : i32
    %c0_i32_1 = arith.constant 0 : i32
    return %c0_i32, %c0_i32_0 : i32, i32
  }
  func.func @transform_2(%arg0: i32) -> (i32, i32, i32) {
    %c0_i32 = arith.constant 0 : i32
    %c0_i32_0 = arith.constant 0 : i32
    %c0_i32_1 = arith.constant 0 : i32
    %c0_i32_2 = arith.constant 0 : i32
    return %c0_i32, %c0_i32_0, %c0_i32_1 : i32, i32, i32
  }
  func.func @transform_3(%arg0: i32) -> (i32, i32, i32) {
    %c0_i32 = arith.constant 0 : i32
    %c0_i32_0 = arith.constant 0 : i32
    %c0_i32_1 = arith.constant 0 : i32
    %c0_i32_2 = arith.constant 0 : i32
    return %c0_i32, %c0_i32_0, %c0_i32_1 : i32, i32, i32
  }
  func.func @transform_4(%arg0: i32) -> (i32, i32) {
    %c0_i32 = arith.constant 0 : i32
    %c0_i32_0 = arith.constant 0 : i32
    return %arg0, %c0_i32 : i32, i32
  }
}

</mosaic_0001>

<bundles_post_ra>
// kernel: tpu_custom_call.1
= control target key start
LH: loop header
LB: loop body
LE: loop exit
PB: predicated region body
PF: predicated region fallthrough
CT: control target
= control target key end

     0   :  { %9 = vsyncpa [#allocation3], 0  ;;  %s970_s0 = inlined_call_operand.hbm [shape: f32[8,16], index: 0, kind: input, shape index: {}]   ;;  %s971_s1 = inlined_call_operand.hbm [shape: bf16[16,128], index: 1, kind: input, shape index: {}]   ;;  %s972_s2 = inlined_call_operand.hbm [shape: bf16[3,128,128], index: 2, kind: input, shape index: {}]   ;;  %s973_s3 = inlined_call_operand.vmem [shape: f32[4,1,128], index: 3, kind: input, shape index: {}]   ;;  %s974_s4 = inlined_call_operand.hbm [shape: f32[8,128], index: 4, kind: output, shape index: {}]  }
   0x1   :  { %10 = vsyncpa [#allocation6], 0 }
   0x2   :  { %11 = vsyncpa [#allocation4], 0  ;;  %s835_s15 = smov [#allocation5]   ;;  %s741_s19 = scalar_lea.hbm %s971_s1, 128 }
   0x3   :  { %s27_s16 = sshll.u32 %s835_s15, 4  ;;  %p742_p0 = scmp.ne.s32.totalorder %s971_s1, %s741_s19  ;;  %s28_s16 = int_to_ptr.vmem [resolvable:$true] %s27_s16 }
   0x4   :  { %p745_p1 = scmp.lt.u32.totalorder %s741_s19, %s971_s1 }
   0x6   :  { %p747_p2 = pnand %p745_p1, %p742_p0 }
   0x8   :  { %750 = shalt.err (!%p747_p2)
}
   0x9   :  { %s751_s24 = scalar_lea.vmem %s28_s16, 128  ;;  %p756_p4 = scmp.lt.s32.totalorder %s28_s16, %s28_s16 }
   0xa   :  { %p752_p3 = scmp.ne.s32.totalorder %s28_s16, %s751_s24  ;;  %p757_p5 = scmp.lt.s32.totalorder %s751_s24, %s751_s24 }
   0xc   :  { %p758_p6 = por %p757_p5, %p756_p4 }
   0xe   :  { %p759_p7 = pnand %p758_p6, %p752_p3 }
  0x10   :  { %762 = shalt.err (!%p759_p7)
}
  0x11   :  { %s836_s25 = smov 64   ;;  %s837_s26 = smov 4  }
  0x12   :  { %33 = dma.hbm_to_vmem [thread:$0]  %s971_s1, 128, %s28_s16, [#allocation6], %s836_s25, %s836_s25, %s837_s26  }
  0x13   :  { %s838_s29 = smov [#allocation2]   ;;  %s839_s5 = smov [#allocation7]  }
  0x14   :  { %s18_s30 = sshll.u32 %s838_s29, 4  ;;  %s39_s6 = sshll.u32 %s839_s5, 4  ;;  %s19_s30 = int_to_ptr.vmem [resolvable:$true] %s18_s30  ;;  %s40_s6 = int_to_ptr.vmem [resolvable:$true] %s39_s6 }
  0x15   :  { %s763_s9 = scalar_lea.hbm %s970_s0, 128 }
  0x16   :  { %p764_p8 = scmp.ne.s32.totalorder %s970_s0, %s763_s9  ;;  %p767_p9 = scmp.lt.u32.totalorder %s763_s9, %s970_s0 }
  0x18   :  { %p769_p10 = pnand %p767_p9, %p764_p8 }
  0x1a   :  { %772 = shalt.err (!%p769_p10)
}
  0x1b   :  { %s773_s1 = scalar_lea.vmem %s19_s30, 128  ;;  %p778_p12 = scmp.lt.s32.totalorder %s19_s30, %s19_s30 }
  0x1c   :  { %p774_p11 = scmp.ne.s32.totalorder %s19_s30, %s773_s1  ;;  %p779_p13 = scmp.lt.s32.totalorder %s773_s1, %s773_s1 }
  0x1e   :  { %p780_p0 = por %p779_p13, %p778_p12 }
  0x20   :  { %p781_p1 = pnand %p780_p0, %p774_p11 }
  0x22   :  { %784 = shalt.err (!%p781_p1)
}
  0x23   :  { %21 = dma.hbm_to_vmem [thread:$0]  %s970_s0, 128, %s19_s30, [#allocation3]  }
  0x24   :  { %s785_s18 = scalar_lea.hbm %s972_s2, 3072 }
  0x25   :  { %p786_p2 = scmp.ne.s32.totalorder %s972_s2, %s785_s18  ;;  %p789_p3 = scmp.lt.u32.totalorder %s785_s18, %s972_s2 }
  0x27   :  { %p791_p4 = pnand %p789_p3, %p786_p2 }
  0x29   :  { %794 = shalt.err (!%p791_p4)
}
  0x2a   :  { %s795_s23 = scalar_lea.vmem %s40_s6, 3072  ;;  %p800_p6 = scmp.lt.s32.totalorder %s40_s6, %s40_s6 }
  0x2b   :  { %p796_p5 = scmp.ne.s32.totalorder %s40_s6, %s795_s23  ;;  %p801_p7 = scmp.lt.s32.totalorder %s795_s23, %s795_s23 }
  0x2d   :  { %p802_p8 = por %p801_p7, %p800_p6 }
  0x2f   :  { %p803_p9 = pnand %p802_p8, %p796_p5 }
  0x31   :  { %806 = shalt.err (!%p803_p9)
}
  0x32   :  { %45 = dma.hbm_to_vmem [thread:$0]  %s972_s2, 3072, %s40_s6, [#allocation6], %s836_s25, %s836_s25, %s837_s26  }
  0x33   :  { %829 = dma.done.wait [#allocation3], 128  }
  0x34   :  { %830 = vsyncadd [#allocation3], 4294967168 }
  0x35   :  { %831 = dma.done.wait [#allocation6], 3200  }
  0x36   :  { %832 = vsyncadd [#allocation6], 4294964096  ;;  %v840_v0 = vmov 0.0   ;;  %vm841_vm0 = vmmov 0   ;;  %vm63_vm1 = vcmask 130048   ;;  %v706_v1 = vld [vmem:[#allocation5] sm:$0xff]  }
  0x37   :  { %632 = vmatprep.subr.bf16.mxu0 %v840_v0  ;;  %634 = vmatprep.mubr.msk.bf16.mxu0 %vm841_vm0, %v840_v0  ;;  %v62_v2 = vld [vmem:[#allocation2] sm:$0xff]  ;;  %v707_v28 = vld [vmem:[#allocation7] sm:$0xff]   ;;  %v708_v29 = vld [vmem:[#allocation7 + $0x8] sm:$0xff]   ;;  %s842_s6 = smov [#allocation8]  }
  0x38   :  { %638 = vmatprep.subr.bf16.mxu1 %v840_v0  ;;  %654 = vmatprep.mubr.msk.bf16.mxu1 %vm841_vm0, %v840_v0  ;;  %v64_v3 = vsel %vm63_vm1, %v62_v2, 0.0  ;;  %v71_v4 = vmul.f32 %v62_v2, %v62_v2  ;;  %v709_v30 = vld [vmem:[#allocation7 + $0x10] sm:$0xff]   ;;  %v710_v31 = vld [vmem:[#allocation7 + $0x18] sm:$0xff]   ;;  %v711_v32 = vld [vmem:[#allocation7 + $0x20] sm:$0xff]   ;;  %s563_s7 = sshll.u32 %s842_s6, 4  ;;  %s564_s7 = int_to_ptr.vmem [resolvable:$true] %s563_s7 }
  0x39   :  { %633 = vmatpush3.bf16.msra.mxu0 %v706_v1  ;;  %v65_v5 = vrot.slane %v64_v3, 4  ;;  %639 = vmatpush3.bf16.msra.mxu1 %v707_v28  ;;  %v712_v33 = vld [vmem:[#allocation7 + $0x28] sm:$0xff]   ;;  %v713_v34 = vld [vmem:[#allocation7 + $0x30] sm:$0xff]   ;;  %v714_v35 = vld [vmem:[#allocation7 + $0x38] sm:$0xff]   ;;  %s807_s8 = scalar_lea.vmem %s564_s7, 128  ;;  %p812_p11 = scmp.lt.s32.totalorder %s564_s7, %s564_s7 }
  0x3a   :  { %658 = vmatprep.subr.bf16.mxu0 %v840_v0  ;;  %v72_v6 = vsel %vm63_vm1, %v71_v4, 0.0  ;;  %640 = vmatprep.subr.bf16.mxu1 %v840_v0  ;;  %v573_v36 = vld [vmem:[%s973_s3] ss:$0 sm:$0xff]  ;;  %v716_v4 = vld [vmem:[#allocation7 + $0x48] sm:$0xff]   ;;  %p808_p10 = scmp.ne.s32.totalorder %s564_s7, %s807_s8  ;;  %p813_p12 = scmp.lt.s32.totalorder %s807_s8, %s807_s8 }
  0x3b   :  { %v66_v7 = vadd.f32 %v65_v5, %v64_v3  ;;  %v73_v8 = vrot.slane %v72_v6, 4  ;;  %v715_v3 = vld [vmem:[#allocation7 + $0x40] sm:$0xff]   ;;  %v717_v5 = vld [vmem:[#allocation7 + $0x50] sm:$0xff]  }
  0x3c   :  { %p814_p13 = por %p813_p12, %p812_p11 }
  0x3d   :  { %v67_v9 = vrot.slane %v66_v7, 2  ;;  %v74_v10 = vadd.f32 %v73_v8, %v72_v6  ;;  %641 = vmatpush3.bf16.msra.mxu1 %v708_v29  ;;  %v718_v6 = vld [vmem:[#allocation7 + $0x58] sm:$0xff]   ;;  %v720_v8 = vld [vmem:[#allocation7 + $0x68] sm:$0xff]  }
  0x3e   :  { %642 = vmatprep.subr.bf16.mxu1 %v840_v0  ;;  %p815_p0 = pnand %p814_p13, %p808_p10 }
  0x3f   :  { %v68_v11 = vadd.f32 %v67_v9, %v66_v7  ;;  %v75_v12 = vrot.slane %v74_v10, 2  ;;  %v719_v7 = vld [vmem:[#allocation7 + $0x60] sm:$0xff]   ;;  %v721_v9 = vld [vmem:[#allocation7 + $0x70] sm:$0xff]  }
  0x41   :  { %v69_v13 = vrot.slane %v68_v11, 1  ;;  %v76_v14 = vadd.f32 %v75_v12, %v74_v10  ;;  %643 = vmatpush3.bf16.msra.mxu1 %v709_v30  ;;  %v722_v10 = vld [vmem:[#allocation7 + $0x78] sm:$0xff]  }
  0x42   :  { %644 = vmatprep.subr.bf16.mxu1 %v840_v0 }
  0x43   :  { %v70_v15 = vadd.f32 %v69_v13, %v68_v11  ;;  %v77_v16 = vrot.slane %v76_v14, 1  ;;  %v576_v11 = vld [vmem:[%s973_s3 + $0x1] ss:$0 sm:$0xff] }
  0x45   :  { %v78_v17 = vadd.f32 %v77_v16, %v76_v14  ;;  %v79_v18 = vmul.f32 0.125, %v70_v15  ;;  %645 = vmatpush3.bf16.msra.mxu1 %v710_v31 }
  0x46   :  { %646 = vmatprep.subr.bf16.mxu1 %v840_v0 }
  0x47   :  { %v80_v19 = vmul.f32 0.125, %v78_v17  ;;  %v81_v20 = vmul.f32 %v79_v18, %v79_v18  ;;  %v84_v24 = vsub.f32 %v62_v2, %v79_v18 }
  0x49   :  { %v82_v21 = vsub.f32 %v80_v19, %v81_v20  ;;  %647 = vmatpush3.bf16.msra.mxu1 %v711_v32 }
  0x4a   :  { %648 = vmatprep.subr.bf16.mxu1 %v840_v0 }
  0x4b   :  { %v83_v22 = vmax.f32 %v82_v21, 0.0 }
  0x4d   :  { %v85_v23 = vadd.f32 1e-05, %v83_v22  ;;  %649 = vmatpush3.bf16.msra.mxu1 %v712_v33 }
  0x4e   :  { %650 = vmatprep.subr.bf16.mxu1 %v840_v0 }
  0x4f   :  { %731 = vrsqrt.f32 %v85_v23 }
  0x51   :  { %651 = vmatpush3.bf16.msra.mxu1 %v713_v34 }
  0x52   :  { %652 = vmatprep.subr.bf16.mxu1 %v840_v0 }
  0x55   :  { %653 = vmatpush3.bf16.msra.mxu1 %v714_v35 }
  0x56   :  { %678 = vmatprep.subr.bf16.mxu1 %v840_v0 }
  0x59   :  { %v732_v25 = vpop.eup %731 }
  0x5a   :  { %v87_v26 = vmul.f32 %v732_v25, %v84_v24 }
  0x5c   :  { %v90_v27 = vpack.c.bf16 %v87_v26, %v87_v26 }
  0x5e   :  { %635 = vmatmul.mubr.msk.bf16.vlgmr.msra.gmra.mrb[0].mxu0 %vm63_vm1, %v90_v27 }
  0x5f   :  { %674 = vmatprep.mubr.msk.bf16.mxu0 %vm841_vm0, %v840_v0  ;;  %659 = vmatpush3.bf16.msra.mxu0 %v715_v3 }
  0x60   :  { %660 = vmatprep.subr.bf16.mxu0 %v840_v0 }
  0x63   :  { %661 = vmatpush3.bf16.msra.mxu0 %v716_v4 }
  0x64   :  { %662 = vmatprep.subr.bf16.mxu0 %v840_v0 }
  0x67   :  { %663 = vmatpush3.bf16.msra.mxu0 %v717_v5 }
  0x68   :  { %664 = vmatprep.subr.bf16.mxu0 %v840_v0 }
  0x6b   :  { %665 = vmatpush3.bf16.msra.mxu0 %v718_v6 }
  0x6c   :  { %666 = vmatprep.subr.bf16.mxu0 %v840_v0 }
  0x6f   :  { %667 = vmatpush3.bf16.msra.mxu0 %v719_v7 }
  0x70   :  { %668 = vmatprep.subr.bf16.mxu0 %v840_v0 }
  0x73   :  { %669 = vmatpush3.bf16.msra.mxu0 %v720_v8 }
  0x74   :  { %670 = vmatprep.subr.bf16.mxu0 %v840_v0 }
  0x77   :  { %671 = vmatpush3.bf16.msra.mxu0 %v721_v9 }
  0x78   :  { %672 = vmatprep.subr.bf16.mxu0 %v840_v0 }
  0x7b   :  { %673 = vmatpush3.bf16.msra.mxu0 %v722_v10 }
 0x131   :  { %v140_v37 = vpop.f32.mrb[0].mxu0 }
 0x132   :  { %v141_v38 = vadd.f32 %v573_v36, %v140_v37  ;;  %v636_v39 = vpop.f32.mrb[1].mxu0 }
 0x133   :  { %v143_v40 = vpop.f32.mrb[2].mxu0 }
 0x134   :  { %v146_v41 = vmax.f32 %v141_v38, 0.0  ;;  %v637_v42 = vpop.f32.mrb[3].mxu0 }
 0x135   :  { %v724_v42 = vld [vmem:[#allocation7 + $0x88] sm:$0xff]  }
 0x136   :  { %v147_v43 = vrot.slane %v146_v41, 4  ;;  %v153_v44 = vmul.f32 %v146_v41, %v146_v41 }
 0x138   :  { %v148_v45 = vadd.f32 %v147_v43, %v146_v41  ;;  %v154_v46 = vrot.slane %v153_v44, 4  ;;  %v725_v43 = vld [vmem:[#allocation7 + $0x90] sm:$0xff]  }
 0x13a   :  { %v149_v47 = vrot.slane %v148_v45, 2  ;;  %v155_v48 = vadd.f32 %v154_v46, %v153_v44  ;;  %v726_v44 = vld [vmem:[#allocation7 + $0x98] sm:$0xff]   ;;  %v728_v46 = vld [vmem:[#allocation7 + $0xa8] sm:$0xff]  }
 0x13c   :  { %v156_v49 = vrot.slane %v155_v48, 2  ;;  %v150_v50 = vadd.f32 %v149_v47, %v148_v45  ;;  %v727_v45 = vld [vmem:[#allocation7 + $0xa0] sm:$0xff]   ;;  %v729_v47 = vld [vmem:[#allocation7 + $0xb0] sm:$0xff]  }
 0x13e   :  { %v157_v51 = vadd.f32 %v156_v49, %v155_v48  ;;  %v151_v52 = vrot.slane %v150_v50, 1  ;;  %v730_v48 = vld [vmem:[#allocation7 + $0xb8] sm:$0xff]   ;;  %v585_v49 = vld [vmem:[%s973_s3 + $0x2] ss:$0 sm:$0xff] }
 0x140   :  { %v158_v53 = vrot.slane %v157_v51, 1  ;;  %v152_v54 = vadd.f32 %v151_v52, %v150_v50 }
 0x142   :  { %v159_v55 = vadd.f32 %v158_v53, %v157_v51  ;;  %v160_v56 = vmul.f32 0.125, %v152_v54 }
 0x144   :  { %v161_v57 = vmul.f32 0.125, %v159_v55  ;;  %v162_v58 = vmul.f32 %v160_v56, %v160_v56  ;;  %v165_v62 = vsub.f32 %v146_v41, %v160_v56  ;;  %v723_v41 = vld [vmem:[#allocation7 + $0x80] sm:$0xff]  }
 0x146   :  { %v163_v59 = vsub.f32 %v161_v57, %v162_v58 }
 0x148   :  { %v164_v60 = vmax.f32 %v163_v59, 0.0 }
 0x14a   :  { %v166_v61 = vadd.f32 1e-05, %v164_v60 }
 0x14c   :  { %733 = vrsqrt.f32 %v166_v61 }
 0x156   :  { %v734_v63 = vpop.eup %733 }
 0x157   :  { %v168_v1 = vmul.f32 %v734_v63, %v165_v62 }
 0x159   :  { %v185_v2 = vpack.c.bf16 %v168_v1, %v168_v1 }
 0x15b   :  { %655 = vmatmul.mubr.bf16.vlgmr.msra.gmra.mrb[0].mxu1 %v185_v2 }
 0x15c   :  { %694 = vmatprep.mubr.msk.bf16.mxu1 %vm841_vm0, %v840_v0  ;;  %679 = vmatpush3.bf16.msra.mxu1 %v723_v41 }
 0x15d   :  { %680 = vmatprep.subr.bf16.mxu1 %v840_v0 }
 0x160   :  { %681 = vmatpush3.bf16.msra.mxu1 %v724_v42 }
 0x161   :  { %682 = vmatprep.subr.bf16.mxu1 %v840_v0 }
 0x164   :  { %683 = vmatpush3.bf16.msra.mxu1 %v725_v43 }
 0x165   :  { %684 = vmatprep.subr.bf16.mxu1 %v840_v0 }
 0x168   :  { %685 = vmatpush3.bf16.msra.mxu1 %v726_v44 }
 0x169   :  { %686 = vmatprep.subr.bf16.mxu1 %v840_v0 }
 0x16c   :  { %687 = vmatpush3.bf16.msra.mxu1 %v727_v45 }
 0x16d   :  { %688 = vmatprep.subr.bf16.mxu1 %v840_v0 }
 0x170   :  { %689 = vmatpush3.bf16.msra.mxu1 %v728_v46 }
 0x171   :  { %690 = vmatprep.subr.bf16.mxu1 %v840_v0 }
 0x174   :  { %691 = vmatpush3.bf16.msra.mxu1 %v729_v47 }
 0x175   :  { %692 = vmatprep.subr.bf16.mxu1 %v840_v0 }
 0x178   :  { %693 = vmatpush3.bf16.msra.mxu1 %v730_v48 }
 0x22e   :  { %v274_v12 = vpop.f32.mrb[0].mxu1 }
 0x22f   :  { %v275_v13 = vadd.f32 %v576_v11, %v274_v12  ;;  %v656_v14 = vpop.f32.mrb[1].mxu1 }
 0x230   :  { %v277_v15 = vpop.f32.mrb[2].mxu1 }
 0x231   :  { %v280_v16 = vmax.f32 %v275_v13, 0.0  ;;  %v657_v17 = vpop.f32.mrb[3].mxu1  ;;  %v594_v15 = vld [vmem:[%s973_s3 + $0x3] ss:$0 sm:$0xff] }
 0x233   :  { %v281_v18 = vrot.slane %v280_v16, 4  ;;  %v287_v19 = vmul.f32 %v280_v16, %v280_v16 }
 0x235   :  { %v282_v20 = vadd.f32 %v281_v18, %v280_v16  ;;  %v288_v21 = vrot.slane %v287_v19, 4 }
 0x237   :  { %v283_v22 = vrot.slane %v282_v20, 2  ;;  %v289_v23 = vadd.f32 %v288_v21, %v287_v19 }
 0x239   :  { %v284_v24 = vadd.f32 %v283_v22, %v282_v20  ;;  %v290_v25 = vrot.slane %v289_v23, 2 }
 0x23b   :  { %v285_v26 = vrot.slane %v284_v24, 1  ;;  %v291_v27 = vadd.f32 %v290_v25, %v289_v23 }
 0x23d   :  { %v286_v28 = vadd.f32 %v285_v26, %v284_v24  ;;  %v292_v29 = vrot.slane %v291_v27, 1 }
 0x23f   :  { %v293_v30 = vadd.f32 %v292_v29, %v291_v27  ;;  %v294_v31 = vmul.f32 0.125, %v286_v28 }
 0x241   :  { %v295_v32 = vmul.f32 0.125, %v293_v30  ;;  %v296_v33 = vmul.f32 %v294_v31, %v294_v31  ;;  %v299_v37 = vsub.f32 %v280_v16, %v294_v31 }
 0x243   :  { %v297_v34 = vsub.f32 %v295_v32, %v296_v33 }
 0x245   :  { %v298_v35 = vmax.f32 %v297_v34, 0.0 }
 0x247   :  { %v300_v36 = vadd.f32 1e-05, %v298_v35 }
 0x249   :  { %735 = vrsqrt.f32 %v300_v36 }
 0x253   :  { %v736_v38 = vpop.eup %735 }
 0x254   :  { %v302_v39 = vmul.f32 %v736_v38, %v299_v37 }
 0x256   :  { %v320_v40 = vpack.c.bf16 %v302_v39, %v302_v39 }
 0x258   :  { %675 = vmatmul.mubr.bf16.vlgmr.msra.gmra.mrb[4].mxu0 %v320_v40 }
 0x32b   :  { %v409_v50 = vpop.f32.mrb[4].mxu0 }
 0x32c   :  { %v410_v51 = vadd.f32 %v585_v49, %v409_v50  ;;  %v676_v52 = vpop.f32.mrb[5].mxu0 }
 0x32d   :  { %v412_v53 = vpop.f32.mrb[6].mxu0 }
 0x32e   :  { %v415_v54 = vmax.f32 %v410_v51, 0.0  ;;  %v677_v55 = vpop.f32.mrb[7].mxu0 }
 0x330   :  { %v416_v56 = vrot.slane %v415_v54, 4  ;;  %v422_v57 = vmul.f32 %v415_v54, %v415_v54 }
 0x332   :  { %v417_v58 = vadd.f32 %v416_v56, %v415_v54  ;;  %v423_v59 = vrot.slane %v422_v57, 4 }
 0x334   :  { %v418_v60 = vrot.slane %v417_v58, 2  ;;  %v424_v61 = vadd.f32 %v423_v59, %v422_v57 }
 0x336   :  { %v419_v62 = vadd.f32 %v418_v60, %v417_v58  ;;  %v425_v63 = vrot.slane %v424_v61, 2 }
 0x338   :  { %v420_v0 = vrot.slane %v419_v62, 1  ;;  %v426_v1 = vadd.f32 %v425_v63, %v424_v61 }
 0x33a   :  { %v421_v2 = vadd.f32 %v420_v0, %v419_v62  ;;  %v427_v3 = vrot.slane %v426_v1, 1 }
 0x33c   :  { %v428_v4 = vadd.f32 %v427_v3, %v426_v1  ;;  %v429_v5 = vmul.f32 0.125, %v421_v2 }
 0x33e   :  { %v430_v6 = vmul.f32 0.125, %v428_v4  ;;  %v431_v7 = vmul.f32 %v429_v5, %v429_v5  ;;  %v434_v11 = vsub.f32 %v415_v54, %v429_v5 }
 0x340   :  { %v432_v8 = vsub.f32 %v430_v6, %v431_v7 }
 0x342   :  { %v433_v9 = vmax.f32 %v432_v8, 0.0 }
 0x344   :  { %v435_v10 = vadd.f32 1e-05, %v433_v9 }
 0x346   :  { %737 = vrsqrt.f32 %v435_v10 }
 0x350   :  { %v738_v12 = vpop.eup %737 }
 0x351   :  { %v437_v13 = vmul.f32 %v738_v12, %v434_v11 }
 0x353   :  { %v455_v14 = vpack.c.bf16 %v437_v13, %v437_v13 }
 0x355   :  { %695 = vmatmul.mubr.bf16.vlgmr.msra.gmra.mrb[4].mxu1 %v455_v14 }
 0x428   :  { %v544_v16 = vpop.f32.mrb[4].mxu1 }
 0x429   :  { %v545_v17 = vadd.f32 %v594_v15, %v544_v16  ;;  %v696_v18 = vpop.f32.mrb[5].mxu1 }
 0x42a   :  { %v547_v19 = vpop.f32.mrb[6].mxu1 }
 0x42b   :  { %v697_v20 = vpop.f32.mrb[7].mxu1  ;;  %v550_v21 = vmul.f32 %v545_v17, %v545_v17 }
 0x42d   :  { %551 = vadd.xlane.f32.xlu0 %v550_v21 }
 0x4ba   :  { %v552_v22 = vpop.xlane.xlu0 %551 }
 0x4bb   :  { %v553_v23 = vadd.f32 1e-12, %v552_v22 }
 0x4bd   :  { %739 = vrsqrt.f32 %v553_v23 }
 0x4c7   :  { %v740_v24 = vpop.eup %739 }
 0x4c8   :  { %v555_v25 = vmul.f32 %v740_v24, %v545_v17 }
 0x4ca   :  { %556 = vst [vmem:[#allocation8] sm:$0xff] %v555_v25 }
 0x4cb   :  { %818 = shalt.err (!%p815_p0)
}
 0x4cc   :  { %s819_s10 = scalar_lea.hbm %s974_s4, 128 }
 0x4cd   :  { %p820_p1 = scmp.ne.s32.totalorder %s974_s4, %s819_s10  ;;  %p823_p2 = scmp.lt.u32.totalorder %s819_s10, %s974_s4 }
 0x4cf   :  { %p825_p3 = pnand %p823_p2, %p820_p1 }
 0x4d1   :  { %828 = shalt.err (!%p825_p3)
}
 0x4d2   :  { %566 = dma.vmem_to_hbm [thread:$0]  %s564_s7, 128, %s974_s4, [#allocation4]  }
 0x4d3   :  { %833 = dma.done.wait [#allocation4], 128  }
 0x4d4   :  { %834 = vsyncadd [#allocation4], 4294967168 }
 0x4d5   :  { %570 = vsyncpa [#allocation3], 1 }
 0x4d6   :  { %571 = vsyncpa [#allocation6], 1 }
 0x4d7   :  { %572 = vsyncpa [#allocation4], 1 }

</bundles_post_ra>
